<compile_context>
chip_gen: v7x
topology: tpu7x:2x2x1
jax: 0.10.0
libtpu: 0.0.40
codegen_flags: <defaults>
</compile_context>

<pallas_src>
import jax
import jax.numpy as jnp
from jax.experimental import pallas as pl
from jax.experimental.pallas import tpu as pltpu

N_INPUT = 1
N_OUTPUT = 1
HIDDEN = [100, 50, 20, 10, 5, 1]

LAYER_DIMS = (
    [(N_INPUT, HIDDEN[0])]
    + [(HIDDEN[i], HIDDEN[i + 1]) for i in range(len(HIDDEN) - 1)]
    + [(HIDDEN[-1], N_OUTPUT)]
)
N_LAYERS = len(LAYER_DIMS)  # 7

PAD = 128          # lane width (max fan_out = 100 <= 128)
SUB = 8            # sublane multiple


def _round_up(v, m):
    return ((v + m - 1) // m) * m


# Packed weight slab: layer k occupies rows [OFFS[k], OFFS[k] + ROWS[k]) of a
# (W_TOTAL_ROWS, 128) bf16 slab; ROWS[k] = fan_in padded to a multiple of 8.
ROWS = [_round_up(fi, SUB) for fi, _ in LAYER_DIMS]   # [8, 104, 56, 24, 16, 8, 8]
OFFS = [0]
for _r in ROWS[:-1]:
    OFFS.append(OFFS[-1] + _r)                        # [0, 8, 112, 168, 192, 208, 216]
W_TOTAL_ROWS = OFFS[-1] + ROWS[-1]                    # 224

BIAS_ROWS = _round_up(N_LAYERS, SUB)                  # 8 (row k = layer k bias)
OUT_LANES = 8                                         # lane-8 output slab (real column 0)
TB_MAX = 512                                          # batch tile


def mlp_kernel(x_ref, w_ref, b_ref, o_ref):
    """Fused MLP forward on one (TB, .) batch tile.

    x_ref: (TB, 1)        f32   real input column
    w_ref: (224, 128)     bf16  packed weights (in_features x out_features per layer)
    b_ref: (8, 128)       f32   row k = layer k bias, zero-padded lanes
    o_ref: (TB, 8)        f32   output; real result in lane 0
    """
    # ----- layer 0: Linear(1, 100) + ReLU as a VPU broadcast (n_input == 1) -----
    x = x_ref[...]                                      # (TB, 1) f32
    w0 = w_ref[0:1, :].astype(jnp.float32)              # (1, 128) — only row 0 is real
    b0 = b_ref[0:1, :]                                  # (1, 128) f32
    h = jnp.maximum(x * w0 + b0, 0.0)                   # (TB, 128) f32; lanes >= 100 stay 0

    # ----- layers 1..6: bf16 MXU matmuls, f32 accumulation -----
    for layer in range(1, N_LAYERS):                    # static unroll (6 tiny matmuls)
        rows = ROWS[layer]                              # Python constants -> static slices
        off = OFFS[layer]
        w = w_ref[off:off + rows, :]                    # (rows, 128) bf16, sublane-aligned
        b = b_ref[layer:layer + 1, :]                   # (1, 128) f32
        h_in = h[:, :rows].astype(jnp.bfloat16)         # padded lanes of h are exactly 0
        h = jnp.dot(h_in, w, preferred_element_type=jnp.float32) + b
        if layer < N_LAYERS - 1:                        # ReLU on all but the final linear
            h = jnp.maximum(h, 0.0)

    o_ref[...] = h[:, :OUT_LANES]                       # lane 0 real; lanes 1..7 are 0


@jax.jit
def mlp_forward(x, w_slab, b_slab):
    """x: (batch, N_INPUT) f32 -> (batch, N_OUTPUT) f32."""
    batch = x.shape[0]
    if batch >= TB_MAX:
        tb = TB_MAX
        b_pad = _round_up(batch, tb)
    else:
        tb = _round_up(max(batch, 1), SUB)
        b_pad = tb
    grid = (b_pad // tb,)

    x_pad = jnp.zeros((b_pad, 1), jnp.float32).at[:batch, :].set(
        x[:, :N_INPUT].astype(jnp.float32))

    out_pad = pl.pallas_call(
        mlp_kernel,
        out_shape=jax.ShapeDtypeStruct((b_pad, OUT_LANES), jnp.float32),
        grid_spec=pltpu.PrefetchScalarGridSpec(
            num_scalar_prefetch=0,
            grid=grid,
            in_specs=[
                pl.BlockSpec((tb, 1), lambda i: (i, 0)),               # batch-tiled input
                pl.BlockSpec((W_TOTAL_ROWS, PAD), lambda i: (0, 0)),   # VMEM-resident weights
                pl.BlockSpec((BIAS_ROWS, PAD), lambda i: (0, 0)),      # VMEM-resident biases
            ],
            out_specs=pl.BlockSpec((tb, OUT_LANES), lambda i: (i, 0)),
        ),
        compiler_params=pltpu.CompilerParams(
            dimension_semantics=("parallel",)),   # v7x megacore splits the batch grid
    )(x_pad, w_slab, b_slab)

    # Padded batch rows carry propagated biases; never read them — slice to real batch.
    return out_pad[:batch, :N_OUTPUT]


def init_params(key):
    """PyTorch nn.Linear-style init; returns packed bf16 weight slab + f32 bias slab."""
    w_slab = jnp.zeros((W_TOTAL_ROWS, PAD), jnp.float32)
    b_slab = jnp.zeros((BIAS_ROWS, PAD), jnp.float32)
    for i, (fan_in, fan_out) in enumerate(LAYER_DIMS):
        key, kw, kb = jax.random.split(key, 3)
        bound = 1.0 / (fan_in ** 0.5)    # matches nn.Linear's U(-1/sqrt(in), 1/sqrt(in))
        w = jax.random.uniform(kw, (fan_in, fan_out), jnp.float32, -bound, bound)
        b = jax.random.uniform(kb, (fan_out,), jnp.float32, -bound, bound)
        w_slab = w_slab.at[OFFS[i]:OFFS[i] + fan_in, :fan_out].set(w)
        b_slab = b_slab.at[i, :fan_out].set(b)
    return w_slab.astype(jnp.bfloat16), b_slab


def mlp_reference(x, w_slab, b_slab):
    """Plain-JAX reference with the same numerics (bf16 weights, bf16 MXU inputs, f32 accum)."""
    w = w_slab.astype(jnp.float32)
    h = x.astype(jnp.float32)
    for i, (fan_in, fan_out) in enumerate(LAYER_DIMS):
        wi = w[OFFS[i]:OFFS[i] + fan_in, :fan_out]
        bi = b_slab[i, :fan_out]
        if i > 0:
            # kernel feeds the MXU bf16 activations — emulate that rounding
            h = h.astype(jnp.bfloat16).astype(jnp.float32)
        h = jnp.dot(h, wi, precision=jax.lax.Precision.HIGHEST) + bi
        if i < N_LAYERS - 1:
            h = jnp.maximum(h, 0.0)
    return h


if __name__ == "__main__":
    key = jax.random.PRNGKey(0)
    k_param, k_x1, k_x2 = jax.random.split(key, 3)

    w_slab, b_slab = init_params(k_param)

    # Small batch: single tile, grid=(1,)
    x_small = jax.random.normal(k_x1, (8, N_INPUT), jnp.float32)
    out_small = jax.block_until_ready(mlp_forward(x_small, w_slab, b_slab))
    ref_small = mlp_reference(x_small, w_slab, b_slab)
    assert out_small.shape == (8, N_OUTPUT), out_small.shape
    assert jnp.allclose(out_small, ref_small, atol=1e-4, rtol=1e-4), (out_small, ref_small)

    # Larger batch: exercises the batch grid (grid=(2,)) and the padding/remainder path
    x_big = jax.random.normal(k_x2, (1000, N_INPUT), jnp.float32)
    out_big = jax.block_until_ready(mlp_forward(x_big, w_slab, b_slab))
    ref_big = mlp_reference(x_big, w_slab, b_slab)
    assert out_big.shape == (1000, N_OUTPUT), out_big.shape
    assert jnp.allclose(out_big, ref_big, atol=1e-4, rtol=1e-4)

    print("KERNEL_OK")
</pallas_src>

<mosaic_0001>
module attributes {stable_mosaic.version = 11 : i64} {
  func.func @mlp_kernel(%arg0: i32, %arg1: memref<8x1xf32, #tpu.memory_space<vmem>>, %arg2: memref<224x128xbf16, #tpu.memory_space<vmem>>, %arg3: memref<8x128xf32, #tpu.memory_space<vmem>>, %arg4: memref<8x8xf32, #tpu.memory_space<vmem>>) attributes {dimension_semantics = [#tpu.dimension_semantics<parallel>], iteration_bounds = array<i64: 1>, scalar_prefetch = 0 : i64, scratch_operands = 0 : i64, tpu.core_type = #tpu.core_type<tc>, window_params = [{transform_indices = @transform_0, window_bounds = array<i64: 8, 1>}, {pipeline_mode = #tpu.pipeline_mode<synchronous>, transform_indices = @transform_1, window_bounds = array<i64: 224, 128>}, {pipeline_mode = #tpu.pipeline_mode<synchronous>, transform_indices = @transform_2, window_bounds = array<i64: 8, 128>}, {transform_indices = @transform_3, window_bounds = array<i64: 8, 8>}]} {
    %c0 = arith.constant 0 : index
    %c0_0 = arith.constant 0 : index
    %0 = vector.load %arg1[%c0, %c0_0] : memref<8x1xf32, #tpu.memory_space<vmem>>, vector<8x1xf32>
    %c0_1 = arith.constant 0 : index
    %c0_2 = arith.constant 0 : index
    %1 = vector.load %arg2[%c0_1, %c0_2] : memref<224x128xbf16, #tpu.memory_space<vmem>>, vector<1x128xbf16>
    %2 = arith.extf %1 : vector<1x128xbf16> to vector<1x128xf32>
    %c0_3 = arith.constant 0 : index
    %c0_4 = arith.constant 0 : index
    %3 = vector.load %arg3[%c0_3, %c0_4] : memref<8x128xf32, #tpu.memory_space<vmem>>, vector<1x128xf32>
    %4 = vector.broadcast %0 : vector<8x1xf32> to vector<8x128xf32>
    %5 = vector.broadcast %2 : vector<1x128xf32> to vector<8x128xf32>
    %6 = arith.mulf %4, %5 : vector<8x128xf32>
    %7 = vector.broadcast %3 : vector<1x128xf32> to vector<8x128xf32>
    %8 = arith.addf %6, %7 : vector<8x128xf32>
    %cst = arith.constant 0.000000e+00 : f32
    %9 = vector.broadcast %cst : f32 to vector<8x128xf32>
    %10 = arith.maximumf %8, %9 : vector<8x128xf32>
    %c8 = arith.constant 8 : index
    %c0_5 = arith.constant 0 : index
    %11 = vector.load %arg2[%c8, %c0_5] : memref<224x128xbf16, #tpu.memory_space<vmem>>, vector<104x128xbf16>
    %c1 = arith.constant 1 : index
    %c0_6 = arith.constant 0 : index
    %12 = vector.load %arg3[%c1, %c0_6] : memref<8x128xf32, #tpu.memory_space<vmem>>, vector<1x128xf32>
    %13 = vector.extract_strided_slice %10 {offsets = [0, 0], sizes = [8, 104], strides = [1, 1]} : vector<8x128xf32> to vector<8x104xf32>
    %14 = arith.truncf %13 : vector<8x104xf32> to vector<8x104xbf16>
    %cst_7 = arith.constant dense<0.000000e+00> : vector<8x128xf32>
    %15 = tpu.matmul %14, %11, %cst_7 {dimension_numbers = #tpu.dot_dimension_numbers<[1], [0], [0], [1], [0, 0, 1, 1], [], []>} : vector<8x104xbf16>, vector<104x128xbf16>, vector<8x128xf32> -> vector<8x128xf32>
    %16 = vector.broadcast %12 : vector<1x128xf32> to vector<8x128xf32>
    %17 = arith.addf %15, %16 : vector<8x128xf32>
    %cst_8 = arith.constant 0.000000e+00 : f32
    %18 = vector.broadcast %cst_8 : f32 to vector<8x128xf32>
    %19 = arith.maximumf %17, %18 : vector<8x128xf32>
    %c112 = arith.constant 112 : index
    %c0_9 = arith.constant 0 : index
    %20 = vector.load %arg2[%c112, %c0_9] : memref<224x128xbf16, #tpu.memory_space<vmem>>, vector<56x128xbf16>
    %c2 = arith.constant 2 : index
    %c0_10 = arith.constant 0 : index
    %21 = vector.load %arg3[%c2, %c0_10] : memref<8x128xf32, #tpu.memory_space<vmem>>, vector<1x128xf32>
    %22 = vector.extract_strided_slice %19 {offsets = [0, 0], sizes = [8, 56], strides = [1, 1]} : vector<8x128xf32> to vector<8x56xf32>
    %23 = arith.truncf %22 : vector<8x56xf32> to vector<8x56xbf16>
    %cst_11 = arith.constant dense<0.000000e+00> : vector<8x128xf32>
    %24 = tpu.matmul %23, %20, %cst_11 {dimension_numbers = #tpu.dot_dimension_numbers<[1], [0], [0], [1], [0, 0, 1, 1], [], []>} : vector<8x56xbf16>, vector<56x128xbf16>, vector<8x128xf32> -> vector<8x128xf32>
    %25 = vector.broadcast %21 : vector<1x128xf32> to vector<8x128xf32>
    %26 = arith.addf %24, %25 : vector<8x128xf32>
    %cst_12 = arith.constant 0.000000e+00 : f32
    %27 = vector.broadcast %cst_12 : f32 to vector<8x128xf32>
    %28 = arith.maximumf %26, %27 : vector<8x128xf32>
    %c168 = arith.constant 168 : index
    %c0_13 = arith.constant 0 : index
    %29 = vector.load %arg2[%c168, %c0_13] : memref<224x128xbf16, #tpu.memory_space<vmem>>, vector<24x128xbf16>
    %c3 = arith.constant 3 : index
    %c0_14 = arith.constant 0 : index
    %30 = vector.load %arg3[%c3, %c0_14] : memref<8x128xf32, #tpu.memory_space<vmem>>, vector<1x128xf32>
    %31 = vector.extract_strided_slice %28 {offsets = [0, 0], sizes = [8, 24], strides = [1, 1]} : vector<8x128xf32> to vector<8x24xf32>
    %32 = arith.truncf %31 : vector<8x24xf32> to vector<8x24xbf16>
    %cst_15 = arith.constant dense<0.000000e+00> : vector<8x128xf32>
    %33 = tpu.matmul %32, %29, %cst_15 {dimension_numbers = #tpu.dot_dimension_numbers<[1], [0], [0], [1], [0, 0, 1, 1], [], []>} : vector<8x24xbf16>, vector<24x128xbf16>, vector<8x128xf32> -> vector<8x128xf32>
    %34 = vector.broadcast %30 : vector<1x128xf32> to vector<8x128xf32>
    %35 = arith.addf %33, %34 : vector<8x128xf32>
    %cst_16 = arith.constant 0.000000e+00 : f32
    %36 = vector.broadcast %cst_16 : f32 to vector<8x128xf32>
    %37 = arith.maximumf %35, %36 : vector<8x128xf32>
    %c192 = arith.constant 192 : index
    %c0_17 = arith.constant 0 : index
    %38 = vector.load %arg2[%c192, %c0_17] : memref<224x128xbf16, #tpu.memory_space<vmem>>, vector<16x128xbf16>
    %c4 = arith.constant 4 : index
    %c0_18 = arith.constant 0 : index
    %39 = vector.load %arg3[%c4, %c0_18] : memref<8x128xf32, #tpu.memory_space<vmem>>, vector<1x128xf32>
    %40 = vector.extract_strided_slice %37 {offsets = [0, 0], sizes = [8, 16], strides = [1, 1]} : vector<8x128xf32> to vector<8x16xf32>
    %41 = arith.truncf %40 : vector<8x16xf32> to vector<8x16xbf16>
    %cst_19 = arith.constant dense<0.000000e+00> : vector<8x128xf32>
    %42 = tpu.matmul %41, %38, %cst_19 {dimension_numbers = #tpu.dot_dimension_numbers<[1], [0], [0], [1], [0, 0, 1, 1], [], []>} : vector<8x16xbf16>, vector<16x128xbf16>, vector<8x128xf32> -> vector<8x128xf32>
    %43 = vector.broadcast %39 : vector<1x128xf32> to vector<8x128xf32>
    %44 = arith.addf %42, %43 : vector<8x128xf32>
    %cst_20 = arith.constant 0.000000e+00 : f32
    %45 = vector.broadcast %cst_20 : f32 to vector<8x128xf32>
    %46 = arith.maximumf %44, %45 : vector<8x128xf32>
    %c208 = arith.constant 208 : index
    %c0_21 = arith.constant 0 : index
    %47 = vector.load %arg2[%c208, %c0_21] : memref<224x128xbf16, #tpu.memory_space<vmem>>, vector<8x128xbf16>
    %c5 = arith.constant 5 : index
    %c0_22 = arith.constant 0 : index
    %48 = vector.load %arg3[%c5, %c0_22] : memref<8x128xf32, #tpu.memory_space<vmem>>, vector<1x128xf32>
    %49 = vector.extract_strided_slice %46 {offsets = [0, 0], sizes = [8, 8], strides = [1, 1]} : vector<8x128xf32> to vector<8x8xf32>
    %50 = arith.truncf %49 : vector<8x8xf32> to vector<8x8xbf16>
    %cst_23 = arith.constant dense<0.000000e+00> : vector<8x128xf32>
    %51 = tpu.matmul %50, %47, %cst_23 {dimension_numbers = #tpu.dot_dimension_numbers<[1], [0], [0], [1], [0, 0, 1, 1], [], []>} : vector<8x8xbf16>, vector<8x128xbf16>, vector<8x128xf32> -> vector<8x128xf32>
    %52 = vector.broadcast %48 : vector<1x128xf32> to vector<8x128xf32>
    %53 = arith.addf %51, %52 : vector<8x128xf32>
    %cst_24 = arith.constant 0.000000e+00 : f32
    %54 = vector.broadcast %cst_24 : f32 to vector<8x128xf32>
    %55 = arith.maximumf %53, %54 : vector<8x128xf32>
    %c216 = arith.constant 216 : index
    %c0_25 = arith.constant 0 : index
    %56 = vector.load %arg2[%c216, %c0_25] : memref<224x128xbf16, #tpu.memory_space<vmem>>, vector<8x128xbf16>
    %c6 = arith.constant 6 : index
    %c0_26 = arith.constant 0 : index
    %57 = vector.load %arg3[%c6, %c0_26] : memref<8x128xf32, #tpu.memory_space<vmem>>, vector<1x128xf32>
    %58 = vector.extract_strided_slice %55 {offsets = [0, 0], sizes = [8, 8], strides = [1, 1]} : vector<8x128xf32> to vector<8x8xf32>
    %59 = arith.truncf %58 : vector<8x8xf32> to vector<8x8xbf16>
    %cst_27 = arith.constant dense<0.000000e+00> : vector<8x128xf32>
    %60 = tpu.matmul %59, %56, %cst_27 {dimension_numbers = #tpu.dot_dimension_numbers<[1], [0], [0], [1], [0, 0, 1, 1], [], []>} : vector<8x8xbf16>, vector<8x128xbf16>, vector<8x128xf32> -> vector<8x128xf32>
    %61 = vector.broadcast %57 : vector<1x128xf32> to vector<8x128xf32>
    %62 = arith.addf %60, %61 : vector<8x128xf32>
    %63 = vector.extract_strided_slice %62 {offsets = [0, 0], sizes = [8, 8], strides = [1, 1]} : vector<8x128xf32> to vector<8x8xf32>
    %c0_28 = arith.constant 0 : index
    %c0_29 = arith.constant 0 : index
    %64 = vector.load %arg4[%c0_28, %c0_29] : memref<8x8xf32, #tpu.memory_space<vmem>>, vector<8x8xf32>
    tpu.vector_store %arg4[%c0_28, %c0_29], %63 {strides = array<i32>} : memref<8x8xf32, #tpu.memory_space<vmem>>, vector<8x8xf32>,
    return
  }
  func.func @transform_0(%arg0: i32) -> (i32, i32) {
    %c0_i32 = arith.constant 0 : i32
    %c0_i32_0 = arith.constant 0 : i32
    return %arg0, %c0_i32 : i32, i32
  }
  func.func @transform_1(%arg0: i32) -> (i32, i32) {
    %c0_i32 = arith.constant 0 : i32
    %c0_i32_0 = arith.constant 0 : i32
    %c0_i32_1 = arith.constant 0 : i32
    return %c0_i32, %c0_i32_0 : i32, i32
  }
  func.func @transform_2(%arg0: i32) -> (i32, i32) {
    %c0_i32 = arith.constant 0 : i32
    %c0_i32_0 = arith.constant 0 : i32
    %c0_i32_1 = arith.constant 0 : i32
    return %c0_i32, %c0_i32_0 : i32, i32
  }
  func.func @transform_3(%arg0: i32) -> (i32, i32) {
    %c0_i32 = arith.constant 0 : i32
    %c0_i32_0 = arith.constant 0 : i32
    return %arg0, %c0_i32 : i32, i32
  }
}

</mosaic_0001>

<bundles_post_ra>
// kernel: mlp_forward.1
= control target key start
LH: loop header
LB: loop body
LE: loop exit
PB: predicated region body
PF: predicated region fallthrough
CT: control target
= control target key end

     0   :  { %8 = vsyncpa [#allocation3], 0  ;;  %s627_s12 = smov [#allocation2]   ;;  %s728_s0 = inlined_call_operand.vmem [shape: f32[8,1], index: 0, kind: input, shape index: {}]   ;;  %s729_s1 = inlined_call_operand.hbm [shape: bf16[224,128], index: 1, kind: input, shape index: {}]   ;;  %s730_s2 = inlined_call_operand.vmem [shape: f32[8,128], index: 2, kind: input, shape index: {}]   ;;  %s731_s3 = inlined_call_operand.vmem [shape: f32[8,8], index: 3, kind: output, shape index: {}]  }
   0x1   :  { %s16_s13 = sshll.u32 %s627_s12, 4  ;;  %s603_s16 = scalar_lea.hbm %s729_s1, 1792  ;;  %s17_s13 = int_to_ptr.vmem [resolvable:$true] %s16_s13 }
   0x2   :  { %p604_p0 = scmp.ne.s32.totalorder %s729_s1, %s603_s16  ;;  %p607_p1 = scmp.lt.u32.totalorder %s603_s16, %s729_s1 }
   0x4   :  { %p609_p2 = pnand %p607_p1, %p604_p0 }
   0x6   :  { %612 = shalt.err (!%p609_p2)
}
   0x7   :  { %s613_s21 = scalar_lea.vmem %s17_s13, 1792  ;;  %p618_p4 = scmp.lt.s32.totalorder %s17_s13, %s17_s13 }
   0x8   :  { %p614_p3 = scmp.ne.s32.totalorder %s17_s13, %s613_s21  ;;  %p619_p5 = scmp.lt.s32.totalorder %s613_s21, %s613_s21 }
   0xa   :  { %p620_p6 = por %p619_p5, %p618_p4 }
   0xc   :  { %p621_p7 = pnand %p620_p6, %p614_p3 }
   0xe   :  { %624 = shalt.err (!%p621_p7)
}
   0xf   :  { %s628_s22 = smov 64   ;;  %s629_s23 = smov 4  }
  0x10   :  { %22 = dma.hbm_to_vmem [thread:$0]  %s729_s1, 1792, %s17_s13, [#allocation3], %s628_s22, %s628_s22, %s629_s23  }
  0x11   :  { %625 = dma.done.wait [#allocation3], 1792  }
  0x12   :  { %626 = vsyncadd [#allocation3], 4294965504  ;;  %v630_v0 = vmov 0   ;;  %v631_v1 = vmov 0.0   ;;  %v29_v2 = vld [vmem:[%s728_s0] sm:$0xff]  ;;  %v590_v4 = vld [vmem:[#allocation2 + $0xc] sm:$0xff]   ;;  %v38_v13 = vlaneseq }
  0x13   :  { %588 = vset.pattern.permute.xlu0 %v630_v0  ;;  %526 = vmatprep.subr.bf16.mxu0 %v631_v1  ;;  %v589_v3 = vld [vmem:[#allocation2 + $0x4] sm:$0xff]   ;;  %v591_v5 = vld [vmem:[#allocation2 + $0x14] sm:$0xff]   ;;  %vm632_vm0 = vmmov 0   ;;  %v592_v6 = vld [vmem:[#allocation2 + $0x1c] sm:$0xff]   ;;  %vm111_vm1 = vcmask 1043456   ;;  %vm107_vm2 = vcmask 850944  }
  0x14   :  { %544 = vmatprep.subr.bf16.mxu1 %v631_v1  ;;  %35 = vperm.xlu0 %588, %v29_v2   ;;  %v596_v7 = vld [vmem:[#allocation2 + $0x38] sm:$0xff]   ;;  %v597_v8 = vld [vmem:[#allocation2 + $0x40] sm:$0xff]   ;;  %v594_v10 = vld [vmem:[#allocation2 + $0x2c] sm:$0xff]   ;;  %v39_v14 = vshrl.u32 %v38_v13, 7  ;;  %vm190_vm3 = vcmask 457728   ;;  %vm256_vm4 = vcmask 195584  }
  0x15   :  { %527 = vmatpush3.bf16.msra.mxu0 %v589_v3  ;;  %540 = vmatprep.mubr.msk.bf16.mxu0 %vm632_vm0, %v631_v1  ;;  %v593_v9 = vld [vmem:[#allocation2 + $0x24] sm:$0xff]   ;;  %v595_v11 = vld [vmem:[#allocation2 + $0x34] ss:$0 sps:$4 sm:$0xff]   ;;  %v30_v15 = vld [vmem:[#allocation2] sm:$0x1]  ;;  %vm318_vm5 = vcmask 130048  }
  0x16   :  { %528 = vmatprep.subr.bf16.mxu0 %v631_v1  ;;  %552 = vmatprep.mubr.msk.bf16.mxu1 %vm632_vm0, %v631_v1  ;;  %v113_v12 = vsel %vm111_vm1, %v595_v11, 0  ;;  %v31_v16 = vunpack.c.l.bf16 %v30_v15  ;;  %v40_v17 = vsub.s32 0, %v39_v14  ;;  %v477_v19 = vld [vmem:[%s730_s2] ss:$0 sm:$0xff]  ;;  %v598_v25 = vld [vmem:[#allocation2 + $0x48] sm:$0xff]   ;;  %v600_v35 = vld [vmem:[#allocation2 + $0x54] sm:$0xff]  }
  0x17   :  { %545 = vmatpush3.bf16.msra.mxu1 %v596_v7  ;;  %v599_v26 = vld [vmem:[#allocation2 + $0x50] ss:$0 sps:$4 sm:$0xff]   ;;  %v478_v28 = vld [vmem:[%s730_s2 + $0x1] ss:$0 sm:$0xff]  ;;  %v601_v37 = vld [vmem:[#allocation2 + $0x5c] ss:$0 sps:$4 sm:$0xff]  }
  0x18   :  { %546 = vmatprep.subr.bf16.mxu1 %v631_v1  ;;  %v41_v18 = vrot.slane %v31_v16, %v40_v17  ;;  %v195_v27 = vsel %vm111_vm1, %v599_v26, 0  ;;  %v261_v38 = vsel %vm111_vm1, %v601_v37, 0  ;;  %v487_v39 = vld [vmem:[%s730_s2 + $0x2] ss:$0 sm:$0xff]  ;;  %v363_v48 = vld [vmem:[#allocation2 + $0x68] sm:$0xf] }
  0x19   :  { %529 = vmatpush3.bf16.msra.mxu0 %v590_v4  ;;  %v602_v46 = vld [vmem:[#allocation2 + $0x60] sm:$0xff]   ;;  %v375_v49 = vsel %vm111_vm1, %v363_v48, 0  ;;  %v418_v58 = vld [vmem:[#allocation2 + $0x6c] sm:$0xf]  ;;  %vm370_vm6 = vcmask 64512  }
  0x1a   :  { %530 = vmatprep.subr.bf16.mxu0 %v631_v1  ;;  %v493_v50 = vld [vmem:[%s730_s2 + $0x3] ss:$0 sm:$0xff]  ;;  %v429_v59 = vsel %vm111_vm1, %v418_v58, 0  ;;  %v497_v60 = vld [vmem:[%s730_s2 + $0x4] ss:$0 sm:$0xff] }
  0x1b   :  { %547 = vmatpush3.bf16.msra.mxu1 %v597_v8 }
  0x1c   :  { %548 = vmatprep.subr.bf16.mxu1 %v631_v1 }
  0x1d   :  { %531 = vmatpush3.bf16.msra.mxu0 %v591_v5 }
  0x1e   :  { %532 = vmatprep.subr.bf16.mxu0 %v631_v1 }
  0x1f   :  { %549 = vmatpush3.bf16.msra.mxu1 %v598_v25 }
  0x20   :  { %550 = vmatprep.subr.bf16.mxu1 %v631_v1 }
  0x21   :  { %533 = vmatpush3.bf16.msra.mxu0 %v592_v6 }
  0x22   :  { %534 = vmatprep.subr.bf16.mxu0 %v631_v1 }
  0x23   :  { %551 = vmatpush3.bf16.msra.mxu1 %v195_v27 }
  0x24   :  { %556 = vmatprep.subr.bf16.mxu1 %v631_v1 }
  0x25   :  { %535 = vmatpush3.bf16.msra.mxu0 %v593_v9 }
  0x26   :  { %536 = vmatprep.subr.bf16.mxu0 %v631_v1 }
  0x29   :  { %537 = vmatpush3.bf16.msra.mxu0 %v594_v10 }
  0x2a   :  { %538 = vmatprep.subr.bf16.mxu0 %v631_v1 }
  0x2d   :  { %539 = vmatpush3.bf16.msra.mxu0 %v113_v12  ;;  %v502_v12 = vld [vmem:[%s730_s2 + $0x6] ss:$0 sm:$0xff] }
  0x2e   :  { %570 = vmatprep.subr.bf16.mxu0 %v631_v1 }
  0x93   :  { %v36_v20 = vpop.permute.xlu0 %35 }
  0x94   :  { %v42_v21 = vmul.f32 %v41_v18, %v36_v20 }
  0x96   :  { %v47_v22 = vadd.f32 %v477_v19, %v42_v21 }
  0x98   :  { %v48_v23 = vmax.f32 %v47_v22, 0.0 }
  0x9a   :  { %v63_v24 = vpack.c.bf16 %v48_v23, %v48_v23 }
  0x9c   :  { %541 = vmatmul.mubr.msk.bf16.vlgmr.msra.gmra.mrb[0].mxu0 %vm107_vm2, %v63_v24 }
  0x9d   :  { %572 = vmatprep.mubr.msk.bf16.mxu0 %vm632_vm0, %v631_v1  ;;  %571 = vmatpush3.bf16.msra.mxu0 %v375_v49 }
 0x16f   :  { %v149_v29 = vpop.f32.mrb[0].mxu0 }
 0x170   :  { %v150_v30 = vadd.f32 %v478_v28, %v149_v29  ;;  %v542_v31 = vpop.f32.mrb[1].mxu0 }
 0x171   :  { %v152_v32 = vpop.f32.mrb[2].mxu0 }
 0x172   :  { %v155_v33 = vmax.f32 %v150_v30, 0.0  ;;  %v543_v34 = vpop.f32.mrb[3].mxu0 }
 0x174   :  { %v164_v36 = vpack.c.bf16 %v155_v33, %v155_v33 }
 0x176   :  { %553 = vmatmul.mubr.msk.bf16.vlgmr.msra.gmra.mrb[0].mxu1 %vm190_vm3, %v164_v36 }
 0x177   :  { %557 = vmatpush3.bf16.msra.mxu1 %v600_v35  ;;  %560 = vmatprep.mubr.msk.bf16.mxu1 %vm632_vm0, %v631_v1 }
 0x178   :  { %558 = vmatprep.subr.bf16.mxu1 %v631_v1 }
 0x17b   :  { %559 = vmatpush3.bf16.msra.mxu1 %v261_v38 }
 0x17c   :  { %564 = vmatprep.subr.bf16.mxu1 %v631_v1 }
 0x249   :  { %v231_v40 = vpop.f32.mrb[0].mxu1 }
 0x24a   :  { %v232_v41 = vadd.f32 %v487_v39, %v231_v40  ;;  %v554_v42 = vpop.f32.mrb[1].mxu1 }
 0x24b   :  { %v234_v43 = vpop.f32.mrb[2].mxu1 }
 0x24c   :  { %v237_v44 = vmax.f32 %v232_v41, 0.0  ;;  %v555_v45 = vpop.f32.mrb[3].mxu1 }
 0x24e   :  { %v242_v47 = vpack.c.bf16 %v237_v44, %v237_v44 }
 0x250   :  { %561 = vmatmul.mubr.msk.bf16.vlgmr.msra.gmra.mrb[4].mxu1 %vm256_vm4, %v242_v47 }
 0x251   :  { %565 = vmatpush3.bf16.msra.mxu1 %v602_v46  ;;  %566 = vmatprep.mubr.msk.bf16.mxu1 %vm632_vm0, %v631_v1 }
 0x252   :  { %576 = vmatprep.subr.bf16.mxu1 %v631_v1 }
 0x323   :  { %v297_v51 = vpop.f32.mrb[4].mxu1 }
 0x324   :  { %v298_v52 = vadd.f32 %v493_v50, %v297_v51  ;;  %v562_v53 = vpop.f32.mrb[5].mxu1 }
 0x325   :  { %v300_v54 = vpop.f32.mrb[6].mxu1 }
 0x326   :  { %v303_v55 = vmax.f32 %v298_v52, 0.0  ;;  %v563_v56 = vpop.f32.mrb[7].mxu1 }
 0x328   :  { %v307_v57 = vpack.c.bf16 %v303_v55, %v303_v55 }
 0x32a   :  { %567 = vmatmul.mubr.msk.bf16.vlgmr.msra.gmra.mrb[8].mxu1 %vm318_vm5, %v307_v57 }
 0x32b   :  { %578 = vmatprep.mubr.msk.bf16.mxu1 %vm632_vm0, %v631_v1  ;;  %577 = vmatpush3.bf16.msra.mxu1 %v429_v59  ;;  %v500_v1 = vld [vmem:[%s730_s2 + $0x5] ss:$0 sm:$0xff] }
 0x3fd   :  { %v356_v61 = vpop.f32.mrb[8].mxu1 }
 0x3fe   :  { %v357_v62 = vadd.f32 %v497_v60, %v356_v61  ;;  %v568_v63 = vpop.f32.mrb[9].mxu1 }
 0x3ff   :  { %v359_v0 = vpop.f32.mrb[10].mxu1 }
 0x400   :  { %v362_v2 = vmax.f32 %v357_v62, 0.0  ;;  %v569_v3 = vpop.f32.mrb[11].mxu1 }
 0x402   :  { %v365_v4 = vpack.c.bf16 %v362_v2, %v362_v2 }
 0x404   :  { %573 = vmatmul.mubr.msk.bf16.vlgmr.msra.gmra.mrb[4].mxu0 %vm370_vm6, %v365_v4 }
 0x4d7   :  { %v411_v5 = vpop.f32.mrb[4].mxu0 }
 0x4d8   :  { %v412_v6 = vadd.f32 %v500_v1, %v411_v5  ;;  %v574_v7 = vpop.f32.mrb[5].mxu0 }
 0x4d9   :  { %v414_v8 = vpop.f32.mrb[6].mxu0 }
 0x4da   :  { %v417_v9 = vmax.f32 %v412_v6, 0.0  ;;  %v575_v10 = vpop.f32.mrb[7].mxu0 }
 0x4dc   :  { %v420_v11 = vpack.c.bf16 %v417_v9, %v417_v9 }
 0x4de   :  { %579 = vmatmul.mubr.msk.bf16.vlgmr.msra.gmra.mrb[12].mxu1 %vm370_vm6, %v420_v11 }
 0x5b1   :  { %v465_v13 = vpop.f32.mrb[12].mxu1 }
 0x5b2   :  { %v466_v14 = vadd.f32 %v502_v12, %v465_v13  ;;  %v580_v15 = vpop.f32.mrb[13].mxu1 }
 0x5b3   :  { %v468_v16 = vpop.f32.mrb[14].mxu1 }
 0x5b4   :  { %471 = vst.msk [vmem:[%s731_s3] sm:$0xff] %vm370_vm6, %v466_v14  ;;  %v581_v17 = vpop.f32.mrb[15].mxu1 }
 0x5b5   :  { %476 = vsyncpa [#allocation3], 1 }

</bundles_post_ra>
